<compile_context>
chip_gen: v6e
topology: v6e:2x2x1
jax: 0.10.0
libtpu: 0.0.40
codegen_flags: <defaults>
</compile_context>

<pallas_src>
import functools

import numpy as np
import jax
import jax.numpy as jnp
from jax.experimental import pallas as pl
from jax.experimental.pallas import tpu as pltpu

# ITU-R 601-2 luma weights used by PIL convert("L") / torchvision Grayscale()
_GRAY_W = (0.299, 0.587, 0.114)


def _round_up(x: int, m: int) -> int:
    return (x + m - 1) // m * m


def _cdiv(a: int, b: int) -> int:
    return (a + b - 1) // b


def _pil_bilinear_weights(in_size: int, out_size: int) -> np.ndarray:
    """Separable PIL-style bilinear (triangle) resampling matrix with antialias
    when downscaling (what torchvision T.Resize does on a PIL image)."""
    scale = in_size / out_size
    filterscale = max(scale, 1.0)
    support = 1.0 * filterscale                      # bilinear filter support
    W = np.zeros((out_size, in_size), dtype=np.float64)
    for i in range(out_size):
        center = (i + 0.5) * scale
        xmin = max(int(center - support + 0.5), 0)
        xmax = min(int(center + support + 0.5), in_size)
        xs = np.arange(xmin, xmax)
        w = np.clip(1.0 - np.abs((xs - center + 0.5) / filterscale), 0.0, None)
        s = w.sum()
        if s > 0.0:
            w = w / s
        W[i, xmin:xmax] = w
    return W.astype(np.float32)


def _vmem_capacity_bytes() -> int:
    try:
        return int(pltpu.get_tpu_info().vmem_capacity_bytes)
    except Exception:
        return 64 << 20                              # conservative (v7x per-TC)


def _vmem_need(h_pad: int, out_h_pad: int, out_w_pad: int, tw: int) -> int:
    """Per-grid-step VMEM footprint, including in-kernel temporaries."""
    return (2 * h_pad * tw                           # int8 image blocks, double-buffered
            + h_pad * tw * 2                         # bf16 cast temp of the image tile
            + 2 * out_h_pad * h_pad * 2              # rh (bf16), double-buffered
            + 2 * tw * out_w_pad * 2                 # rw3t blocks (bf16), double-buffered
            + out_h_pad * tw * (4 + 2)               # f32 intermediate + its bf16 copy
            + 2 * out_h_pad * out_w_pad * 4)         # resident f32 accumulator


def _plan_tiles(H: int, W3: int, out_h_pad: int, out_w_pad: int):
    """Pick (h_pad, tw, ncores, nt_per_core, w3_pad) for the (H, 3W) image view."""
    h_pad = _round_up(H, 32)                         # int8 sublane tile multiple
    w3_128 = _round_up(W3, 128)
    budget = _vmem_capacity_bytes() // 2             # leave headroom

    # Largest lane tile (multiple of 128, capped at 2048) that fits the budget.
    tw_cap, t = 128, 128
    while t <= min(2048, w3_128):
        if _vmem_need(h_pad, out_h_pad, out_w_pad, t) <= budget:
            tw_cap = t
        t += 128

    nt_total = _cdiv(w3_128, tw_cap)
    if nt_total > 1:
        ncores = 2                                   # use both v7x TCs; ~free on 1-TC chips
        nt_total = _round_up(nt_total, 2)
    else:
        ncores = 1
    tw = _round_up(_cdiv(w3_128, nt_total), 128)     # balance tiles, avoid overshoot
    w3_pad = nt_total * tw
    return h_pad, tw, ncores, nt_total // ncores, w3_pad


@functools.lru_cache(maxsize=None)
def _resample_matrices(H, W, out_h, out_w, h_pad, w3_pad, out_h_pad, out_w_pad):
    # Row resample with ToTensor's 1/255 folded in: (out_h_pad, h_pad), bf16.
    rh = np.zeros((out_h_pad, h_pad), np.float32)
    rh[:out_h, :H] = _pil_bilinear_weights(H, out_h) / 255.0
    # Column resample with the grayscale luma folded in, laid out for the native
    # (H, 3W) image view: row 3*w + c carries g_c * rw[j, w].  Padded rows are 0.
    rw = _pil_bilinear_weights(W, out_w)             # (out_w, W)
    rw3t = np.zeros((w3_pad, out_w_pad), np.float32)
    for c, g in enumerate(_GRAY_W):
        rw3t[c:3 * W:3, :out_w] = g * rw.T
    return (jnp.asarray(rh, dtype=jnp.bfloat16),
            jnp.asarray(rw3t, dtype=jnp.bfloat16))


def _transform_kernel(x_ref, rh_ref, rw3t_ref, o_ref):
    # x_ref   : (h_pad, tw)            int8  (uint8 ^ 0x80; -128 offset fixed in epilogue)
    # rh_ref  : (out_h_pad, h_pad)     bf16  row resample * (1/255)
    # rw3t_ref: (tw, out_w_pad)        bf16  col resample * luma, (H, 3W) layout
    # o_ref   : (out_h_pad, out_w_pad) f32   resident accumulator across the W-tile axis
    @pl.when(pl.program_id(1) == 0)
    def _():
        o_ref[...] = jnp.zeros_like(o_ref)

    x = x_ref[...].astype(jnp.bfloat16)              # -128..127 ints are exact in bf16
    tmp = jnp.dot(rh_ref[...], x, preferred_element_type=jnp.float32)
    o_ref[...] += jnp.dot(tmp.astype(jnp.bfloat16), rw3t_ref[...],
                          preferred_element_type=jnp.float32)


@functools.lru_cache(maxsize=None)
def _build_transform(H, W, out_h, out_w):
    out_h_pad = _round_up(out_h, 8)
    out_w_pad = _round_up(out_w, 128)
    h_pad, tw, ncores, nt_per_core, w3_pad = _plan_tiles(H, 3 * W, out_h_pad, out_w_pad)

    need = _vmem_need(h_pad, out_h_pad, out_w_pad, tw)
    cap = _vmem_capacity_bytes()
    vmem_limit = int(min(cap * 3 // 4, max(16 << 20, 2 * need)))

    flops = 2 * out_h_pad * h_pad * w3_pad + 2 * out_h_pad * w3_pad * out_w_pad
    bytes_accessed = (h_pad * w3_pad                                  # int8 image
                      + out_h_pad * h_pad * 2 + w3_pad * out_w_pad * 2  # bf16 matrices
                      + ncores * out_h_pad * out_w_pad * 4)           # f32 partials

    kernel = pl.pallas_call(
        _transform_kernel,
        out_shape=jax.ShapeDtypeStruct((ncores, out_h_pad, out_w_pad), jnp.float32),
        grid=(ncores, nt_per_core),
        in_specs=[
            pl.BlockSpec((h_pad, tw), lambda c, j: (0, c * nt_per_core + j)),
            pl.BlockSpec((out_h_pad, h_pad), lambda c, j: (0, 0)),
            pl.BlockSpec((tw, out_w_pad), lambda c, j: (c * nt_per_core + j, 0)),
        ],
        out_specs=pl.BlockSpec((None, out_h_pad, out_w_pad), lambda c, j: (c, 0, 0)),
        compiler_params=pltpu.CompilerParams(
            dimension_semantics=("parallel", "arbitrary"),   # W-tile axis is a reduction
            vmem_limit_bytes=vmem_limit),
        cost_estimate=pl.CostEstimate(flops=flops, transcendentals=0,
                                      bytes_accessed=bytes_accessed),
    )

    rh, rw3t = _resample_matrices(H, W, out_h, out_w, h_pad, w3_pad,
                                  out_h_pad, out_w_pad)

    def run(x_hwc_u8):
        # Native layout: (H, W, 3) -> (H, 3W) is a free, contiguous view.
        x = x_hwc_u8.reshape(H, 3 * W)
        # uint8 -> int8 transport (x ^ 0x80 == x - 128 mod 256); one elementwise
        # fusion together with the zero pad to tile multiples.
        x = jax.lax.bitcast_convert_type(x ^ jnp.uint8(0x80), jnp.int8)
        x = jnp.pad(x, ((0, h_pad - H), (0, w3_pad - 3 * W)))
        parts = kernel(x, rh, rw3t)                  # (ncores, out_h_pad, out_w_pad)
        # Sum per-core partials and add the exact -128 offset correction:
        # sum(rh)/255 == 1/255 and sum(luma)*sum(rw) == 1  =>  offset == 128/255.
        out = jnp.sum(parts, axis=0) + jnp.float32(128.0 / 255.0)
        return out[:out_h, :out_w]

    return jax.jit(run)


def image_transform(x_hwc_u8: jax.Array, path: str, target: int = 28):
    """JAX/Pallas equivalent of ImageTransform.forward.

    x_hwc_u8: (H, W, 3) uint8 "decoded image" (stands in for Image.open(path)).
    Returns (image, label); image is (1, out_h, out_w) float32 in [0, 1].
    """
    H, W, C = x_hwc_u8.shape
    assert C == 3 and x_hwc_u8.dtype == jnp.uint8
    # torchvision Resize(int): short edge -> target, long edge scaled.
    if H <= W:
        out_h, out_w = target, int(target * W / H)
    else:
        out_h, out_w = int(target * H / W), target

    out = _build_transform(H, W, out_h, out_w)(x_hwc_u8)
    image = out.reshape(1, out_h, out_w)             # ToTensor() CHW layout
    label = int(list(path.replace(".png", ""))[-1])
    return image, label


def _host_reference(x_u8, out_h, out_w):
    xn = np.asarray(x_u8).astype(np.float64)
    H, W, _ = xn.shape
    gray = xn @ np.array(_GRAY_W, dtype=np.float64)
    rh = _pil_bilinear_weights(H, out_h).astype(np.float64)
    rw = _pil_bilinear_weights(W, out_w).astype(np.float64)
    return (rh @ gray @ rw.T) / 255.0


if __name__ == "__main__":
    key = jax.random.PRNGKey(0)
    k1, k2 = jax.random.split(key)

    # --- 32x32 RGB "decoded PNG" -> 28x28 (single tile, single core) ---------
    x1 = jax.random.randint(k1, (32, 32, 3), 0, 256, dtype=jnp.int32).astype(jnp.uint8)
    img1, lbl1 = image_transform(x1, "samples/digit_7.png")
    img1 = jax.block_until_ready(img1)
    assert img1.shape == (1, 28, 28)
    assert img1.dtype == jnp.float32
    assert lbl1 == 7
    assert bool(jnp.all(jnp.isfinite(img1)))
    ref1 = _host_reference(x1, 28, 28)
    err1 = float(np.max(np.abs(np.asarray(img1[0]) - ref1)))
    assert err1 < 2e-2, f"err1={err1}"

    # --- 32x1600 wide image -> 28x1400 (multi-tile reduction + 2-core split) --
    x2 = jax.random.randint(k2, (32, 1600, 3), 0, 256, dtype=jnp.int32).astype(jnp.uint8)
    img2, lbl2 = image_transform(x2, "digit_3.png")
    img2 = jax.block_until_ready(img2)
    assert img2.shape == (1, 28, 1400)
    assert img2.dtype == jnp.float32
    assert lbl2 == 3
    assert bool(jnp.all(jnp.isfinite(img2)))
    ref2 = _host_reference(x2, 28, 1400)
    err2 = float(np.max(np.abs(np.asarray(img2[0]) - ref2)))
    assert err2 < 2e-2, f"err2={err2}"

    print("KERNEL_OK")
</pallas_src>

<mosaic_0001>
module attributes {stable_mosaic.version = 11 : i64} {
  func.func @_transform_kernel(%arg0: i32, %arg1: i32, %arg2: memref<32x128xi8, #tpu.memory_space<vmem>>, %arg3: memref<32x32xbf16, #tpu.memory_space<vmem>>, %arg4: memref<128x128xbf16, #tpu.memory_space<vmem>>, %arg5: memref<1x32x128xf32, #tpu.memory_space<vmem>>) attributes {dimension_semantics = [#tpu.dimension_semantics<parallel>, #tpu.dimension_semantics<arbitrary>], iteration_bounds = array<i64: 1, 1>, scalar_prefetch = 0 : i64, scratch_operands = 0 : i64, tpu.core_type = #tpu.core_type<tc>, window_params = [{transform_indices = @transform_0, window_bounds = array<i64: 32, 128>}, {pipeline_mode = #tpu.pipeline_mode<synchronous>, transform_indices = @transform_1, window_bounds = array<i64: 32, 32>}, {transform_indices = @transform_2, window_bounds = array<i64: 128, 128>}, {transform_indices = @transform_3, window_bounds = array<i64: 1, 32, 128>}]} {
    %c0_i32 = arith.constant 0 : i32
    %0 = arith.cmpi eq, %arg1, %c0_i32 : i32
    %1 = arith.extui %0 : i1 to i32
    %c0_i32_0 = arith.constant 0 : i32
    %2 = arith.cmpi ne, %1, %c0_i32_0 : i32
    scf.if %2 {
      %cst_13 = arith.constant 0.000000e+00 : f32
      %16 = vector.broadcast %cst_13 : f32 to vector<32x128xf32>
      %c0_14 = arith.constant 0 : index
      %c0_15 = arith.constant 0 : index
      %c0_16 = arith.constant 0 : index
      %17 = vector.load %arg5[%c0_14, %c0_15, %c0_16] : memref<1x32x128xf32, #tpu.memory_space<vmem>>, vector<1x32x128xf32>
      %18 = vector.shape_cast %17 : vector<1x32x128xf32> to vector<32x128xf32>
      %19 = vector.shape_cast %16 : vector<32x128xf32> to vector<1x32x128xf32>
      tpu.vector_store %arg5[%c0_14, %c0_15, %c0_16], %19 {strides = array<i32>} : memref<1x32x128xf32, #tpu.memory_space<vmem>>, vector<1x32x128xf32>,
    } else {
    }
    %c0 = arith.constant 0 : index
    %c0_1 = arith.constant 0 : index
    %3 = vector.load %arg2[%c0, %c0_1] : memref<32x128xi8, #tpu.memory_space<vmem>>, vector<32x128xi8>
    %4 = arith.sitofp %3 : vector<32x128xi8> to vector<32x128xbf16>
    %c0_2 = arith.constant 0 : index
    %c0_3 = arith.constant 0 : index
    %5 = vector.load %arg3[%c0_2, %c0_3] : memref<32x32xbf16, #tpu.memory_space<vmem>>, vector<32x32xbf16>
    %cst = arith.constant dense<0.000000e+00> : vector<32x128xf32>
    %6 = tpu.matmul %5, %4, %cst {dimension_numbers = #tpu.dot_dimension_numbers<[1], [0], [0], [1], [0, 0, 1, 1], [], []>} : vector<32x32xbf16>, vector<32x128xbf16>, vector<32x128xf32> -> vector<32x128xf32>
    %c0_4 = arith.constant 0 : index
    %c0_5 = arith.constant 0 : index
    %c0_6 = arith.constant 0 : index
    %7 = vector.load %arg5[%c0_4, %c0_5, %c0_6] : memref<1x32x128xf32, #tpu.memory_space<vmem>>, vector<1x32x128xf32>
    %8 = vector.shape_cast %7 : vector<1x32x128xf32> to vector<32x128xf32>
    %9 = arith.truncf %6 : vector<32x128xf32> to vector<32x128xbf16>
    %c0_7 = arith.constant 0 : index
    %c0_8 = arith.constant 0 : index
    %10 = vector.load %arg4[%c0_7, %c0_8] : memref<128x128xbf16, #tpu.memory_space<vmem>>, vector<128x128xbf16>
    %cst_9 = arith.constant dense<0.000000e+00> : vector<32x128xf32>
    %11 = tpu.matmul %9, %10, %cst_9 {dimension_numbers = #tpu.dot_dimension_numbers<[1], [0], [0], [1], [0, 0, 1, 1], [], []>} : vector<32x128xbf16>, vector<128x128xbf16>, vector<32x128xf32> -> vector<32x128xf32>
    %12 = arith.addf %8, %11 : vector<32x128xf32>
    %c0_10 = arith.constant 0 : index
    %c0_11 = arith.constant 0 : index
    %c0_12 = arith.constant 0 : index
    %13 = vector.load %arg5[%c0_10, %c0_11, %c0_12] : memref<1x32x128xf32, #tpu.memory_space<vmem>>, vector<1x32x128xf32>
    %14 = vector.shape_cast %13 : vector<1x32x128xf32> to vector<32x128xf32>
    %15 = vector.shape_cast %12 : vector<32x128xf32> to vector<1x32x128xf32>
    tpu.vector_store %arg5[%c0_10, %c0_11, %c0_12], %15 {strides = array<i32>} : memref<1x32x128xf32, #tpu.memory_space<vmem>>, vector<1x32x128xf32>,
    return
  }
  func.func @transform_0(%arg0: i32, %arg1: i32) -> (i32, i32) {
    %c1_i32 = arith.constant 1 : i32
    %0 = arith.muli %arg0, %c1_i32 : i32
    %1 = arith.addi %0, %arg1 : i32
    %c0_i32 = arith.constant 0 : i32
    %c0_i32_0 = arith.constant 0 : i32
    return %c0_i32, %1 : i32, i32
  }
  func.func @transform_1(%arg0: i32, %arg1: i32) -> (i32, i32) {
    %c0_i32 = arith.constant 0 : i32
    %c0_i32_0 = arith.constant 0 : i32
    %c0_i32_1 = arith.constant 0 : i32
    return %c0_i32, %c0_i32_0 : i32, i32
  }
  func.func @transform_2(%arg0: i32, %arg1: i32) -> (i32, i32) {
    %c1_i32 = arith.constant 1 : i32
    %0 = arith.muli %arg0, %c1_i32 : i32
    %1 = arith.addi %0, %arg1 : i32
    %c0_i32 = arith.constant 0 : i32
    %c0_i32_0 = arith.constant 0 : i32
    return %1, %c0_i32 : i32, i32
  }
  func.func @transform_3(%arg0: i32, %arg1: i32) -> (i32, i32, i32) {
    %c0_i32 = arith.constant 0 : i32
    %c0_i32_0 = arith.constant 0 : i32
    %c0_i32_1 = arith.constant 0 : i32
    return %arg0, %c0_i32, %c0_i32_0 : i32, i32, i32
  }
}

</mosaic_0001>

<bundles_post_ra>
// kernel: run.1
= control target key start
LH: loop header
LB: loop body
LE: loop exit
PB: predicated region body
PF: predicated region fallthrough
CT: control target
= control target key end

     0   :  { %vm79_vm0 = vcmask 261120   ;;  %s410_s0 = inlined_call_operand.vmem [shape: s8[32,128], index: 0, kind: input, shape index: {}]   ;;  %s411_s1 = inlined_call_operand.vmem [shape: bf16[32,32], index: 1, kind: input, shape index: {}]   ;;  %s412_s2 = inlined_call_operand.vmem [shape: bf16[128,128], index: 2, kind: input, shape index: {}]   ;;  %s413_s3 = inlined_call_operand.vmem [shape: f32[1,32,128], index: 3, kind: output, shape index: {}]  }
   0x1   :  { %v62_v0 = vld [vmem:[%s410_s0] sm:$0xff]  ;;  %v335_v4 = vld [vmem:[%s412_s2 + $0x38] sm:$0xff]   ;;  %v336_v5 = vld [vmem:[%s412_s2 + $0x30] sm:$0xff]  }
   0x2   :  { %v63_v1 = vunpack.c.l.s8.bf16 %v62_v0  ;;  %v64_v2 = vunpack.c.h.s8.bf16 %v62_v0  ;;  %v333_v3 = vld [vmem:[%s411_s1] sm:$0xff]   ;;  %312 = vmatprep.subr.bf16.mxu1 %v335_v4  ;;  %v334_v6 = vld [vmem:[%s411_s1 + $0x8] sm:$0xff]   ;;  %v339_v9 = vld [vmem:[%s412_s2 + $0x18] sm:$0xff]  }
   0x3   :  { %308 = vmatprep.mubr.msk.bf16.mxu0 %vm79_vm0, %v333_v3  ;;  %313 = vmatpush3.bf16.msra.mxu1 %v335_v4  ;;  %v337_v7 = vld [vmem:[%s412_s2 + $0x28] sm:$0xff]   ;;  %v338_v8 = vld [vmem:[%s412_s2 + $0x20] sm:$0xff]   ;;  %v340_v10 = vld [vmem:[%s412_s2 + $0x10] sm:$0xff]  }
   0x4   :  { %304 = vmatprep.subr.bf16.mxu0 %v64_v2  ;;  %314 = vmatprep.subr.bf16.mxu1 %v336_v5  ;;  %v341_v11 = vld [vmem:[%s412_s2 + $0x8] sm:$0xff]   ;;  %v342_v12 = vld [vmem:[%s412_s2] sm:$0xff]  }
   0x5   :  { %305 = vmatpush3.bf16.msra.mxu0 %v64_v2 }
   0x6   :  { %306 = vmatprep.subr.bf16.mxu0 %v63_v1 }
   0x7   :  { %315 = vmatpush3.bf16.msra.mxu1 %v336_v5 }
   0x8   :  { %316 = vmatprep.subr.bf16.mxu1 %v337_v7 }
   0x9   :  { %307 = vmatpush3.bf16.msra.mxu0 %v63_v1 }
   0xb   :  { %317 = vmatpush3.bf16.msra.mxu1 %v337_v7 }
   0xc   :  { %309 = vmatmul.mubr.msk.bf16.vlgmr.msra.gmra.mxu0 %vm79_vm0, %v334_v6  ;;  %318 = vmatprep.subr.bf16.mxu1 %v338_v8 }
   0xf   :  { %319 = vmatpush3.bf16.msra.mxu1 %v338_v8 }
  0x10   :  { %320 = vmatprep.subr.bf16.mxu1 %v339_v9 }
  0x13   :  { %321 = vmatpush3.bf16.msra.mxu1 %v339_v9 }
  0x14   :  { %322 = vmatprep.subr.bf16.mxu1 %v340_v10 }
  0x17   :  { %323 = vmatpush3.bf16.msra.mxu1 %v340_v10 }
  0x18   :  { %324 = vmatprep.subr.bf16.mxu1 %v341_v11 }
  0x1b   :  { %325 = vmatpush3.bf16.msra.mxu1 %v341_v11 }
  0x1c   :  { %326 = vmatprep.subr.bf16.mxu1 %v342_v12 }
  0x1f   :  { %327 = vmatpush3.bf16.msra.mxu1 %v342_v12 }
  0xcc   :  { %v310_v13 = vpop.f32.mrf.mxu0 }
  0xce   :  { %v120_v14 = vpop.f32.mrf.mxu0 }
  0xd0   :  { %v311_v15 = vpop.f32.mrf.mxu0 }
  0xd1   :  { %v140_v18 = vpack.c.bf16 %v311_v15, %v310_v13 }
  0xd2   :  { %v123_v16 = vpop.f32.mrf.mxu0 }
  0xd3   :  { %v139_v17 = vpack.c.bf16 %v123_v16, %v120_v14 }
  0xd5   :  { %328 = vmatprep.mubr.bf16.mxu1 %v139_v17 }
  0xd6   :  { %329 = vmatmul.mubr.bf16.vlgmr.msra.gmra.mxu1 %v140_v18 }
 0x196   :  { %v330_v19 = vpop.f32.mrf.mxu1 }
 0x197   :  { %260 = vst [vmem:[%s413_s3 + $0x10] sm:$0xff] %v330_v19 }
 0x198   :  { %v239_v20 = vpop.f32.mrf.mxu1 }
 0x199   :  { %258 = vst [vmem:[%s413_s3] sm:$0xff] %v239_v20 }
 0x19a   :  { %v331_v21 = vpop.f32.mrf.mxu1 }
 0x19b   :  { %261 = vst [vmem:[%s413_s3 + $0x18] sm:$0xff] %v331_v21 }
 0x19c   :  { %v242_v22 = vpop.f32.mrf.mxu1 }
 0x19d   :  { %259 = vst [vmem:[%s413_s3 + $0x8] sm:$0xff] %v242_v22 }

</bundles_post_ra>
